<compile_context>
chip_gen: v7x
topology: tpu7x:2x2x1
jax: 0.10.0
libtpu: 0.0.40
codegen_flags: <defaults>
</compile_context>

<pallas_src>
import functools

import jax
import jax.numpy as jnp
from jax.experimental import pallas as pl
from jax.experimental.pallas import tpu as pltpu


# ----------------------------------------------------------------------------
# Pallas kernel: y[M, N] = x[M, K] @ w[K, N]   (w already transposed, f32 acc)
# ----------------------------------------------------------------------------

def _matmul_kernel(x_ref, w_ref, o_ref, acc_ref):
    # K is the last grid axis; the output block index is constant across it, so the
    # f32 accumulator (and o_ref) stay resident while K tiles stream through.
    @pl.when(pl.program_id(2) == 0)
    def _init():
        acc_ref[...] = jnp.zeros_like(acc_ref)

    # Native-dtype (bf16) operands straight into the MXU; f32 accumulation.
    acc_ref[...] += jnp.dot(x_ref[...], w_ref[...],
                            preferred_element_type=jnp.float32)

    @pl.when(pl.program_id(2) == pl.num_programs(2) - 1)
    def _store():
        o_ref[...] = acc_ref[...].astype(o_ref.dtype)


# Conservative double-buffered tile footprint budget: fits v7x's 64 MiB physical VMEM
# with headroom; v5e/v6e (128 MiB) trivially accommodate it once vmem_limit is raised.
_VMEM_TILE_BUDGET = 48 * 1024 * 1024


def _round_up(x, m):
    return ((x + m - 1) // m) * m


def _tile_cands(dim, align, cap):
    """Legal tile sizes: `align`-aligned power-of-two multiples that divide dim, plus dim."""
    cands = {dim}
    t = align
    while t <= min(dim, cap):
        if dim % t == 0:
            cands.add(t)
        t *= 2
    return sorted(cands)


def _tile_vmem_bytes(tm, tn, tk, x_it, w_it, out_it):
    # double-buffered input/output blocks + resident f32 accumulator
    return 2 * (tm * tk * x_it + tk * tn * w_it + tm * tn * out_it) + tm * tn * 4


def _select_tiles(m_pad, N, K, x_it, w_it, out_it, small_m):
    tm_cands = _tile_cands(m_pad, 16, 2048)
    tn_cands = _tile_cands(N, 128, 4096)
    tk_cands = _tile_cands(K, 128, 4096)
    best = None
    for tm in tm_cands:
        for tn in tn_cands:
            for tk in tk_cands:
                vm = _tile_vmem_bytes(tm, tn, tk, x_it, w_it, out_it)
                if vm > _VMEM_TILE_BUDGET:
                    continue
                steps = (m_pad // tm) * (N // tn) * (K // tk)
                if small_m:
                    # Decode GEMV: keep >=2 N-tiles (v7x: both TCs stream half the
                    # weight), then maximize the streamed weight-tile bytes to amortize
                    # the ~0.35 us per-grid-step overhead, then fewest steps.
                    score = ((N // tn) >= 2, tk * tn * w_it, -steps)
                else:
                    # Prefill: minimize HBM re-streaming traffic, then largest tk.
                    traffic = ((m_pad // tm) * K * N * w_it
                               + (N // tn) * m_pad * K * x_it
                               + m_pad * N * out_it)
                    score = (-traffic, tk, -steps)
                if best is None or score > best[0]:
                    best = (score, (tm, tn, tk))
    if best is None:   # pathological shapes: smallest legal tiles
        return tm_cands[0], tn_cands[0], tk_cands[0]
    return best[1]


def matmul_xw(x2d, w_t, out_dtype=jnp.float32):
    """y[M, N] = x2d[M, K] @ w_t[K, N] via a tiled Pallas TPU matmul (f32 accumulation)."""
    M, K = x2d.shape
    K2, N = w_t.shape
    assert K == K2, (x2d.shape, w_t.shape)

    x_it = jnp.dtype(x2d.dtype).itemsize
    w_it = jnp.dtype(w_t.dtype).itemsize
    out_it = jnp.dtype(out_dtype).itemsize

    # Pad rows to a sublane-packing-friendly multiple (16 covers bf16 packing).
    m_pad = _round_up(max(M, 1), 16)
    if m_pad != M:
        x2d = jnp.pad(x2d, ((0, m_pad - M), (0, 0)))

    tm, tn, tk = _select_tiles(m_pad, N, K, x_it, w_it, out_it, small_m=(M <= 16))
    grid = (m_pad // tm, N // tn, K // tk)

    vm_bytes = _tile_vmem_bytes(tm, tn, tk, x_it, w_it, out_it)
    # Raise the scoped VMEM limit above v5e's 16 MiB default, capped well below v7x's
    # 64 MiB physical VMEM.
    vmem_limit = int(min(max(vm_bytes + (8 << 20), 32 << 20), 56 << 20))

    cost = pl.CostEstimate(
        flops=2 * m_pad * N * K,
        transcendentals=0,
        bytes_accessed=((N // tn) * m_pad * K * x_it       # activation re-streaming
                        + (m_pad // tm) * K * N * w_it     # weight re-streaming
                        + m_pad * N * out_it),             # output written once
    )

    y = pl.pallas_call(
        _matmul_kernel,
        out_shape=jax.ShapeDtypeStruct((m_pad, N), out_dtype),
        grid=grid,
        in_specs=[
            pl.BlockSpec((tm, tk), lambda i, j, k: (i, k)),   # activation tile
            pl.BlockSpec((tk, tn), lambda i, j, k: (k, j)),   # streamed (K, N) weight tile
        ],
        out_specs=pl.BlockSpec((tm, tn), lambda i, j, k: (i, j)),
        scratch_shapes=[pltpu.VMEM((tm, tn), jnp.float32)],
        compiler_params=pltpu.CompilerParams(
            dimension_semantics=("parallel", "parallel", "arbitrary"),
            vmem_limit_bytes=vmem_limit),
        cost_estimate=cost,
    )(x2d, w_t)

    return y[:M] if m_pad != M else y


# ----------------------------- jitted forward steps -----------------------------

@jax.jit
def _prefill_step(x2d, w_t):
    # prefill: y = x @ W.T with bf16 operands, f32 accumulate/output.
    return matmul_xw(x2d.astype(w_t.dtype), w_t, out_dtype=jnp.float32)


@functools.partial(jax.jit, static_argnames=("n_valid",))
def _decode_step(x2d, fw_t, n_valid):
    # decode: one fused jit per token (cast -> pad -> pallas matmul -> slice).
    y = matmul_xw(x2d.astype(fw_t.dtype), fw_t, out_dtype=jnp.float32)
    return y[:, :n_valid]


# ----------------------------- GateLayer module -----------------------------

# Module-level global, mirrors the torch `global indices_list_all` populated upstream.
indices_list_all = []


class GateLayer:
    def __init__(self, weight, num, sparsity, memory_limit, name=None):
        weight = jnp.asarray(weight)                         # (out_features, in_features)
        self.out_features, self.in_features = int(weight.shape[0]), int(weight.shape[1])
        # Single canonical HBM copy of the dense weight: bf16, pre-transposed to (K, N)
        # so the kernel runs the lane-dense x @ W_t MXU shape with contiguous weight DMA.
        # No duplicate f32 master is retained (halves per-layer HBM footprint).
        self.weight_t = jnp.asarray(weight.T).astype(jnp.bfloat16)
        self.neuron_num = int(self.out_features * sparsity)
        self.num = num
        self.memory_limit = memory_limit
        self.weight_updated = False
        self.filtered_W = jnp.zeros((self.neuron_num, self.in_features), jnp.bfloat16)
        self.filtered_W_t = None                              # (K, n_pad) kernel layout
        self._n_valid = self.neuron_num

    def forward(self, x):
        B, S, K = x.shape
        x2d = x.reshape(B * S, K)
        if S > 1:
            # ---- prefill: full y = x @ weight.T via the tiled Pallas matmul ----
            self.weight_updated = False
            y = _prefill_step(x2d, self.weight_t)
            return y.reshape(B, S, self.out_features)
        else:
            # ---- decode: gather filtered_W once, then weight-streaming GEMV ----
            if not self.weight_updated:
                global indices_list_all
                indices = jnp.asarray(indices_list_all[self.num - 6])
                n_valid = int(indices.shape[0])
                n_pad = _round_up(max(n_valid, 1), 256)
                # Column gather on the (K, N) canonical bf16 copy -> (K, n_valid); zero-
                # pad N to a 256 multiple so output tiles stay lane-dense (unmasked vst)
                # and tn remains freely selectable.
                fw_t = jnp.take(self.weight_t, indices, axis=1)
                if n_pad != n_valid:
                    fw_t = jnp.pad(fw_t, ((0, 0), (0, n_pad - n_valid)))
                self.filtered_W_t = fw_t
                self.filtered_W = jnp.asarray(fw_t[:, :n_valid].T)   # (n, K) attribute
                self._n_valid = n_valid
                # TODO(synk): torch offloads the dense weight to CPU when memory_limit
                # is set (self.weight = self.weight.cpu()); host offload is skipped here.
                self.weight_updated = True
            y = _decode_step(x2d, self.filtered_W_t, self._n_valid)
            return y.reshape(B, S, self._n_valid)


# ----------------------------- demo -----------------------------

if __name__ == "__main__":
    key = jax.random.PRNGKey(0)
    k_w, k_x, k_d, k_i = jax.random.split(key, 4)

    hidden, inter = 256, 512          # weight: (out_features=inter, in_features=hidden)
    batch, seq = 1, 8
    sparsity = 0.4                    # -> 204 neurons: exercises the 256-pad + slice path

    weight = jax.random.normal(k_w, (inter, hidden), jnp.float32)
    layer = GateLayer(weight, num=6, sparsity=sparsity, memory_limit=False)

    w_bf16 = weight.astype(jnp.bfloat16)   # layer stores the dense weight in bf16

    # --- prefill pass (seq > 1) ---
    x_prefill = jax.random.normal(k_x, (batch, seq, hidden), jnp.float32)
    y_prefill = layer.forward(x_prefill)
    jax.block_until_ready(y_prefill)

    ref_prefill = jnp.einsum("bsh,oh->bso", x_prefill.astype(jnp.bfloat16), w_bf16,
                             preferred_element_type=jnp.float32)
    assert y_prefill.shape == (batch, seq, inter)
    assert y_prefill.dtype == jnp.float32
    assert jnp.allclose(y_prefill, ref_prefill, atol=5e-2, rtol=5e-2)
    assert not layer.weight_updated

    # Upstream selection layers would have filled this global; simulate it here.
    indices = jax.random.permutation(k_i, inter)[: layer.neuron_num]
    indices_list_all.append(indices)

    # --- decode pass (seq == 1): first call gathers filtered_W = weight[indices, :] ---
    x_decode = jax.random.normal(k_d, (batch, 1, hidden), jnp.float32)
    y_decode = layer.forward(x_decode)
    jax.block_until_ready(y_decode)

    assert layer.weight_updated
    assert layer.filtered_W.shape == (layer.neuron_num, hidden)
    ref_decode = jnp.einsum("bsh,nh->bsn", x_decode.astype(jnp.bfloat16),
                            w_bf16[indices, :], preferred_element_type=jnp.float32)
    assert y_decode.shape == (batch, 1, layer.neuron_num)
    assert jnp.allclose(y_decode, ref_decode, atol=5e-2, rtol=5e-2)

    # --- second decode call reuses the cached filtered weight (no re-gather) ---
    y_decode2 = layer.forward(x_decode)
    jax.block_until_ready(y_decode2)
    assert jnp.allclose(y_decode2, ref_decode, atol=5e-2, rtol=5e-2)

    print("KERNEL_OK")
</pallas_src>

<mosaic_0001>
module attributes {stable_mosaic.version = 11 : i64} {
  func.func @_matmul_kernel(%arg0: i32, %arg1: i32, %arg2: i32, %arg3: memref<16x256xbf16, #tpu.memory_space<vmem>>, %arg4: memref<256x256xbf16, #tpu.memory_space<vmem>>, %arg5: memref<16x256xf32, #tpu.memory_space<vmem>>, %arg6: memref<16x256xf32, #tpu.memory_space<vmem>>) attributes {dimension_semantics = [#tpu.dimension_semantics<parallel>, #tpu.dimension_semantics<parallel>, #tpu.dimension_semantics<arbitrary>], iteration_bounds = array<i64: 1, 2, 1>, scalar_prefetch = 0 : i64, scratch_operands = 1 : i64, tpu.core_type = #tpu.core_type<tc>, window_params = [{transform_indices = @transform_0, window_bounds = array<i64: 16, 256>}, {transform_indices = @transform_1, window_bounds = array<i64: 256, 256>}, {transform_indices = @transform_2, window_bounds = array<i64: 16, 256>}]} {
    %c0_i32 = arith.constant 0 : i32
    %0 = arith.cmpi eq, %arg2, %c0_i32 : i32
    %1 = arith.extui %0 : i1 to i32
    %c0_i32_0 = arith.constant 0 : i32
    %2 = arith.cmpi ne, %1, %c0_i32_0 : i32
    scf.if %2 {
      %cst_10 = arith.constant 0.000000e+00 : f32
      %12 = vector.broadcast %cst_10 : f32 to vector<16x256xf32>
      %c0_11 = arith.constant 0 : index
      %c0_12 = arith.constant 0 : index
      %13 = vector.load %arg6[%c0_11, %c0_12] : memref<16x256xf32, #tpu.memory_space<vmem>>, vector<16x256xf32>
      tpu.vector_store %arg6[%c0_11, %c0_12], %12 {strides = array<i32>} : memref<16x256xf32, #tpu.memory_space<vmem>>, vector<16x256xf32>,
    } else {
    }
    %c0 = arith.constant 0 : index
    %c0_1 = arith.constant 0 : index
    %3 = vector.load %arg6[%c0, %c0_1] : memref<16x256xf32, #tpu.memory_space<vmem>>, vector<16x256xf32>
    %c0_2 = arith.constant 0 : index
    %c0_3 = arith.constant 0 : index
    %4 = vector.load %arg3[%c0_2, %c0_3] : memref<16x256xbf16, #tpu.memory_space<vmem>>, vector<16x256xbf16>
    %c0_4 = arith.constant 0 : index
    %c0_5 = arith.constant 0 : index
    %5 = vector.load %arg4[%c0_4, %c0_5] : memref<256x256xbf16, #tpu.memory_space<vmem>>, vector<256x256xbf16>
    %cst = arith.constant dense<0.000000e+00> : vector<16x256xf32>
    %6 = tpu.matmul %4, %5, %cst {dimension_numbers = #tpu.dot_dimension_numbers<[1], [0], [0], [1], [0, 0, 1, 1], [], []>} : vector<16x256xbf16>, vector<256x256xbf16>, vector<16x256xf32> -> vector<16x256xf32>
    %7 = arith.addf %3, %6 : vector<16x256xf32>
    %c0_6 = arith.constant 0 : index
    %c0_7 = arith.constant 0 : index
    %8 = vector.load %arg6[%c0_6, %c0_7] : memref<16x256xf32, #tpu.memory_space<vmem>>, vector<16x256xf32>
    tpu.vector_store %arg6[%c0_6, %c0_7], %7 {strides = array<i32>} : memref<16x256xf32, #tpu.memory_space<vmem>>, vector<16x256xf32>,
    %c0_i32_8 = arith.constant 0 : i32
    %9 = arith.cmpi eq, %arg2, %c0_i32_8 : i32
    %10 = arith.extui %9 : i1 to i32
    %c0_i32_9 = arith.constant 0 : i32
    %11 = arith.cmpi ne, %10, %c0_i32_9 : i32
    scf.if %11 {
      %c0_10 = arith.constant 0 : index
      %c0_11 = arith.constant 0 : index
      %12 = vector.load %arg6[%c0_10, %c0_11] : memref<16x256xf32, #tpu.memory_space<vmem>>, vector<16x256xf32>
      %c0_12 = arith.constant 0 : index
      %c0_13 = arith.constant 0 : index
      %13 = vector.load %arg5[%c0_12, %c0_13] : memref<16x256xf32, #tpu.memory_space<vmem>>, vector<16x256xf32>
      tpu.vector_store %arg5[%c0_12, %c0_13], %12 {strides = array<i32>} : memref<16x256xf32, #tpu.memory_space<vmem>>, vector<16x256xf32>,
    } else {
    }
    return
  }
  func.func @transform_0(%arg0: i32, %arg1: i32, %arg2: i32) -> (i32, i32) {
    %c0_i32 = arith.constant 0 : i32
    return %arg0, %arg2 : i32, i32
  }
  func.func @transform_1(%arg0: i32, %arg1: i32, %arg2: i32) -> (i32, i32) {
    %c0_i32 = arith.constant 0 : i32
    return %arg2, %arg1 : i32, i32
  }
  func.func @transform_2(%arg0: i32, %arg1: i32, %arg2: i32) -> (i32, i32) {
    %c0_i32 = arith.constant 0 : i32
    return %arg0, %arg1 : i32, i32
  }
}

</mosaic_0001>

<bundles_post_ra>
// kernel: _prefill_step.1
= control target key start
LH: loop header
LB: loop body
LE: loop exit
PB: predicated region body
PF: predicated region fallthrough
CT: control target
= control target key end

     0   :  { %7 = vsyncpa [#allocation4], 0  ;;  %s1081_s0 = inlined_call_operand.vmem [shape: bf16[16,256], index: 0, kind: input, shape index: {}]   ;;  %s1082_s1 = inlined_call_operand.hbm [shape: bf16[256,512], index: 1, kind: input, shape index: {}]   ;;  %s1083_s2 = inlined_call_operand.vmem [shape: f32[16,512], index: 2, kind: output, shape index: {}]  }
   0x1   :  { %9 = vsyncpa [#allocation4 + $0x1], 0  ;;  %s905_s9 = smov 0   ;;  %s907_s10 = smov 0  }
   0x2   :  { %s909_s11 = smov 0   ;;  %s911_s12 = smov 0  }
   0x3   :  { %s913_s13 = smov 0   ;;  %s915_s14 = smov 0  }
   0x4 LB: > { %s643_s15 = sadd.s32 4294967295, %s884_s14   ;;  %s30_s16 = sadd.s32 1, %s880_s13  ;;  %s884_s14 = sphi %s915_s14, %s15_s14   ;;  %s880_s13 = sphi %s913_s13, %s1094_s13   ;;  %s876_s12 = sphi %s911_s12, %s1093_s12   ;;  %s872_s11 = sphi %s909_s11, %s1092_s11   ;;  %s868_s10 = sphi %s907_s10, %s1091_s10   ;;  %s864_s9 = sphi %s905_s9, %s1090_s9  }
   0x5   : > { %p32_p0 = scmp.ge.s32.totalorder %s30_s16, 2  ;;  %s71_s17 = sadd.s32 1, %s872_s11 }
   0x6   : > { %p78_p1 = scmp.ne.s32.totalorder %s872_s11, %s868_s10  ;;  %p79_p2 = scmp.eq.s32.totalorder %s884_s14, 0 }
   0x7   : > { %s1096_s16 = smov (%p32_p0, %s30_s16), 0  ;;  %p84_p4 = scmp.ne.s32.totalorder %s868_s10, %s864_s9 }
   0x8   : > { %p941_p3 = por %p79_p2, %p78_p1  ;;  %s67_s19 = ssub.s32 %s880_s13, %s1096_s16 }
   0x9   : > { %p85_p5 = scmp.eq.s32.totalorder %s643_s15, 0  ;;  %p69_p6 = scmp.eq.s32.totalorder %s67_s19, 0 }
   0xa   : > { %p110_p7 = scmp.eq.s32.totalorder %s643_s15, 1  ;;  %p701_p10 = scmp.lt.s32.totalorder %s884_s14, 2 }
   0xb   : > { %p948_p8 = por %p85_p5, %p84_p4  ;;  %s151_s23 = sand.u32 1, %s872_s11  }
   0xc   : > { %s953_s21 = scalar_select %p69_p6, %s872_s11, %s71_s17  }
   0xd   : > { %p955_p9 = por %p110_p7, %p78_p1  ;;  %s693_s24 = sshll.u32 %s880_s13, 7 }
   0xe   : > { %s648_s25 = sshll.u32 %s151_s23, 8  ;;  %s965_s28 = scalar_lea.hbm %s1082_s1, %s693_s24 }
   0xf   : > { %s1086_s22 = scalar_select %p955_p9, 1, 0 }
  0x10   : > { %s155_s29 = scalar_lea.vmem [#allocation3], %s648_s25  ;;  %p969_p11 = pnand %p701_p10, %p941_p3 }
  0x11   : > { %s165_s30 = sshll.u32 %s155_s29, 4  ;;  %s976_s4 = scalar_lea.sflag [#allocation4], %s151_s23  ;;  %s973_s30 = int_to_ptr.vmem [resolvable:$true] %s165_s30 }
  0x12   : > { %s804_s5 = scalar_lea.hbm %s965_s28, 4096  ;;  %p806_p0 = pneg %p969_p11 }
  0x13   : > { %p805_p13 = scmp.ne.s32.totalorder %s965_s28, %s804_s5  ;;  %s809_s8 = scalar_lea.hbm %s1082_s1, 8192 }
  0x14   : > { %p810_p3 = scmp.lt.u32.totalorder %s965_s28, %s1082_s1  ;;  %p811_p4 = scmp.lt.u32.totalorder %s809_s8, %s804_s5 }
  0x15   : > { %p807_p1 = pnand %p806_p0, %p805_p13  ;;  %p813_p6 = scmp.lt.u32.totalorder %s804_s5, %s965_s28 }
  0x16   : > { %p812_p5 = por %p811_p4, %p810_p3 }
  0x17   : > { %p808_p2 = pneg %p807_p1 }
  0x18   : > { %p814_p7 = por %p813_p6, %p812_p5 }
  0x1a   : > { %p815_p10 = pnand %p814_p7, %p808_p2 }
  0x1c   : > { %818 = shalt.err (!%p815_p10)
}
  0x1d   : > { %s819_s17 = scalar_lea.vmem %s973_s30, 4096  ;;  %s886_s18 = smov [#allocation3]  }
  0x1e   : > { %p820_p13 = scmp.ne.s32.totalorder %s973_s30, %s819_s17  ;;  %s824_s19 = sshll.u32 %s886_s18, 4  ;;  %s825_s19 = int_to_ptr.vmem [resolvable:$false] %s824_s19 }
  0x1f   : > { %s826_s23 = scalar_lea.vmem %s825_s19, 8192  ;;  %p827_p9 = scmp.lt.s32.totalorder %s973_s30, %s825_s19 }
  0x20   : > { %p822_p1 = pnand %p820_p13, %p806_p0  ;;  %p828_p3 = scmp.lt.s32.totalorder %s826_s23, %s819_s17 }
  0x22   : > { %p823_p12 = pneg %p822_p1  ;;  %p829_p4 = por %p828_p3, %p827_p9 }
  0x24   : > { %p830_p5 = pnand %p829_p4, %p823_p12 }
  0x26   : > { %833 = shalt.err (!%p830_p5)
}
  0x27   : > { %s887_s24 = smov 256   ;;  %s888_s25 = smov 128  }
  0x28   : > { %s889_s26 = smov 8   ;;  %p173_p0 = scmp.lt.s32.totalorder %s884_s14, 3 }
  0x29   : > { %700 = dma.hbm_to_vmem [thread:$0]  (!%p969_p11), %s965_s28, 4096, %s973_s30, %s976_s4, %s887_s24, %s888_s25, %s889_s26  }
  0x2a   : > { %p1088_p2 = scmp.ge.s32.totalorder %s884_s14, 1 }
  0x2c   : > { %p174_p6 = pnand %p1088_p2, %p173_p0 }
  0x2d   : > { %s1008_s27 = sand.u32 (!%p174_p6), 1, %s868_s10  }
  0x2e   : > { %177 = sbr.rel (%p174_p6) target bundleno = 343 (0x157), region = 28  ;;  %s652_s29 = sshll.u32 (!%p174_p6), %s1008_s27, 8 }
  0x2f   : > { %s180_s5 = scalar_lea.sflag (!%p174_p6), [#allocation4], %s1008_s27  ;;  %s1012_s6 = scalar_lea.vmem (!%p174_p6), [#allocation3], %s652_s29 }
  0x35   : > { %859 = dma.done.wait (%p948_p8), %s180_s5, 4096  }
  0x36   : > { %861 = vsyncadd (%p948_p8), %s180_s5, 4294963200  ;;  %v753_v0 = vld [vmem:[%s1012_s6 + $0x4] ss:$8 sps:$4 sm:$0xff]   ;;  %v755_v1 = vld [vmem:[%s1012_s6] ss:$8 sps:$4 sm:$0xff]   ;;  %s653_s4 = sshll.u32 %s1008_s27, 5 }
  0x37   : > { %445 = vmatprep.subr.bf16.mxu0 %v753_v0  ;;  %v756_v2 = vld [vmem:[%s1012_s6 + $0x14] ss:$8 sps:$4 sm:$0xff]   ;;  %v758_v3 = vld [vmem:[%s1012_s6 + $0x10] ss:$8 sps:$4 sm:$0xff]   ;;  %v759_v4 = vld [vmem:[%s1012_s6 + $0x24] ss:$8 sps:$4 sm:$0xff]  }
  0x38   : > { %446 = vmatpush1.bf16.msra.mxu0 %v755_v1  ;;  %v761_v5 = vld [vmem:[%s1012_s6 + $0x20] ss:$8 sps:$4 sm:$0xff]   ;;  %v762_v6 = vld [vmem:[%s1012_s6 + $0x34] ss:$8 sps:$4 sm:$0xff]   ;;  %v764_v7 = vld [vmem:[%s1012_s6 + $0x30] ss:$8 sps:$4 sm:$0xff]  }
  0x39   : > { %447 = vmatprep.subr.bf16.mxu0 %v756_v2  ;;  %v765_v8 = vld [vmem:[%s1012_s6 + $0x44] ss:$8 sps:$4 sm:$0xff]   ;;  %v767_v9 = vld [vmem:[%s1012_s6 + $0x40] ss:$8 sps:$4 sm:$0xff]   ;;  %v768_v10 = vld [vmem:[%s1012_s6 + $0x54] ss:$8 sps:$4 sm:$0xff]  }
  0x3a   : > { %v770_v11 = vld [vmem:[%s1012_s6 + $0x50] ss:$8 sps:$4 sm:$0xff]   ;;  %v771_v12 = vld [vmem:[%s1012_s6 + $0x64] ss:$8 sps:$4 sm:$0xff]   ;;  %v773_v14 = vld [vmem:[%s1012_s6 + $0x60] ss:$8 sps:$4 sm:$0xff]  }
  0x3b   : > { %v803_v13 = vld [vmem:[%s1081_s0 + $0x4] ss:$8 sps:$4 sm:$0xff]   ;;  %v774_v15 = vld [vmem:[%s1012_s6 + $0x74] ss:$8 sps:$4 sm:$0xff]   ;;  %v776_v16 = vld [vmem:[%s1012_s6 + $0x70] ss:$8 sps:$4 sm:$0xff]  }
  0x3c   : > { %448 = vmatpush1.bf16.msra.mxu0 %v758_v3  ;;  %477 = vmatprep.mubr.bf16.mxu0 %v803_v13  ;;  %v777_v17 = vld [vmem:[%s1012_s6 + $0x84] ss:$8 sps:$4 sm:$0xff]   ;;  %v779_v18 = vld [vmem:[%s1012_s6 + $0x80] ss:$8 sps:$4 sm:$0xff]   ;;  %v780_v19 = vld [vmem:[%s1012_s6 + $0x94] ss:$8 sps:$4 sm:$0xff]  }
  0x3d   : > { %449 = vmatprep.subr.bf16.mxu0 %v759_v4  ;;  %v782_v20 = vld [vmem:[%s1012_s6 + $0x90] ss:$8 sps:$4 sm:$0xff]   ;;  %v783_v21 = vld [vmem:[%s1012_s6 + $0xa4] ss:$8 sps:$4 sm:$0xff]   ;;  %v785_v22 = vld [vmem:[%s1012_s6 + $0xa0] ss:$8 sps:$4 sm:$0xff]  }
  0x3e   : > { %v786_v23 = vld [vmem:[%s1012_s6 + $0xb4] ss:$8 sps:$4 sm:$0xff]   ;;  %v788_v24 = vld [vmem:[%s1012_s6 + $0xb0] ss:$8 sps:$4 sm:$0xff]   ;;  %v789_v25 = vld [vmem:[%s1012_s6 + $0xc4] ss:$8 sps:$4 sm:$0xff]  }
  0x3f   : > { %v791_v26 = vld [vmem:[%s1012_s6 + $0xc0] ss:$8 sps:$4 sm:$0xff]   ;;  %v792_v27 = vld [vmem:[%s1012_s6 + $0xd4] ss:$8 sps:$4 sm:$0xff]   ;;  %v794_v28 = vld [vmem:[%s1012_s6 + $0xd0] ss:$8 sps:$4 sm:$0xff]  }
  0x40   : > { %450 = vmatpush1.bf16.msra.mxu0 %v761_v5  ;;  %v795_v29 = vld [vmem:[%s1012_s6 + $0xe4] ss:$8 sps:$4 sm:$0xff]   ;;  %v797_v30 = vld [vmem:[%s1012_s6 + $0xe0] ss:$8 sps:$4 sm:$0xff]   ;;  %v798_v31 = vld [vmem:[%s1012_s6 + $0xf4] ss:$8 sps:$4 sm:$0xff]  }
  0x41   : > { %451 = vmatprep.subr.bf16.mxu0 %v762_v6  ;;  %v800_v32 = vld [vmem:[%s1012_s6 + $0xf0] ss:$8 sps:$4 sm:$0xff]   ;;  %v801_v33 = vld [vmem:[%s1081_s0] ss:$8 sps:$4 sm:$0xff]   ;;  %s212_s7 = scalar_lea.vmem [#allocation5], %s653_s4  ;;  %p1089_p8 = scmp.ne.s32.totalorder %s1086_s22, 0 }
  0x42   : > { %s694_s8 = sshll.u32 (%p1089_p8), %s876_s12, 4 }
  0x43   : > { %s519_s17 = scalar_lea.vmem (%p1089_p8), %s1083_s2, %s694_s8 }
  0x44   : > { %452 = vmatpush1.bf16.msra.mxu0 %v764_v7 }
  0x45   : > { %453 = vmatprep.subr.bf16.mxu0 %v765_v8 }
  0x48   : > { %454 = vmatpush1.bf16.msra.mxu0 %v767_v9 }
  0x49   : > { %455 = vmatprep.subr.bf16.mxu0 %v768_v10 }
  0x4c   : > { %456 = vmatpush1.bf16.msra.mxu0 %v770_v11 }
  0x4d   : > { %457 = vmatprep.subr.bf16.mxu0 %v771_v12 }
  0x50   : > { %458 = vmatpush1.bf16.msra.mxu0 %v773_v14 }
  0x51   : > { %459 = vmatprep.subr.bf16.mxu0 %v774_v15 }
  0x54   : > { %460 = vmatpush1.bf16.msra.mxu0 %v776_v16 }
  0x55   : > { %461 = vmatprep.subr.bf16.mxu0 %v777_v17 }
  0x58   : > { %462 = vmatpush1.bf16.msra.mxu0 %v779_v18 }
  0x59   : > { %463 = vmatprep.subr.bf16.mxu0 %v780_v19 }
  0x5c   : > { %464 = vmatpush1.bf16.msra.mxu0 %v782_v20 }
  0x5d   : > { %465 = vmatprep.subr.bf16.mxu0 %v783_v21 }
  0x60   : > { %466 = vmatpush1.bf16.msra.mxu0 %v785_v22 }
  0x61   : > { %467 = vmatprep.subr.bf16.mxu0 %v786_v23 }
  0x64   : > { %468 = vmatpush1.bf16.msra.mxu0 %v788_v24 }
  0x65   : > { %469 = vmatprep.subr.bf16.mxu0 %v789_v25 }
  0x68   : > { %470 = vmatpush1.bf16.msra.mxu0 %v791_v26 }
  0x69   : > { %471 = vmatprep.subr.bf16.mxu0 %v792_v27 }
  0x6c   : > { %472 = vmatpush1.bf16.msra.mxu0 %v794_v28 }
  0x6d   : > { %473 = vmatprep.subr.bf16.mxu0 %v795_v29 }
  0x70   : > { %474 = vmatpush1.bf16.msra.mxu0 %v797_v30 }
  0x71   : > { %475 = vmatprep.subr.bf16.mxu0 %v798_v31 }
  0x74   : > { %476 = vmatpush1.bf16.msra.mxu0 %v800_v32 }
  0x77   : > { %478 = vmatmul.mubr.bf16.vlgmr.msra.gmra.mrb[0].mxu0 %v801_v33 }
 0x148   : > { %513 = sbr.rel (!%p1089_p8) target bundleno = 343 (0x157), region = 44 }
 0x14a   : > { %v479_v34 = vpop.f32.mrb[0].mxu0 }
 0x14b   : > { %503 = vst [vmem:[%s212_s7] sm:$0xff] %v479_v34  ;;  %v481_v35 = vpop.f32.mrb[1].mxu0 }
 0x14c   : > { %504 = vst [vmem:[%s212_s7 + $0x8] sm:$0xff] %v481_v35  ;;  %v483_v36 = vpop.f32.mrb[2].mxu0 }
 0x14d   : > { %505 = vst [vmem:[%s212_s7 + $0x10] sm:$0xff] %v483_v36  ;;  %v485_v37 = vpop.f32.mrb[3].mxu0 }
 0x14e   : > { %506 = vst [vmem:[%s212_s7 + $0x18] sm:$0xff] %v485_v37 }
 0x152   : > { %v532_v38 = vld [vmem:[%s212_s7] sm:$0xff] }
 0x153   : > { %v534_v39 = vld [vmem:[%s212_s7 + $0x8] sm:$0xff]  ;;  %533 = vst [vmem:[%s519_s17] sm:$0xff] %v532_v38 }
 0x154   : > { %v536_v40 = vld [vmem:[%s212_s7 + $0x10] sm:$0xff]  ;;  %535 = vst [vmem:[%s519_s17 + $0x8] sm:$0xff] %v534_v39 }
 0x155   : > { %v538_v41 = vld [vmem:[%s212_s7 + $0x18] sm:$0xff]  ;;  %537 = vst [vmem:[%s519_s17 + $0x20] sm:$0xff] %v536_v40 }
 0x156   : > { %539 = vst [vmem:[%s519_s17 + $0x28] sm:$0xff] %v538_v41 }
 0x157 PF: > { %s15_s14 = sadd.s32 1, %s884_s14   ;;  %s1090_s9 = smov %s868_s10 }
 0x158   : > { %p12_p9 = scmp.ge.s32.totalorder %s15_s14, 4   ;;  %s1091_s10 = smov %s872_s11 }
 0x159   : > { %s1092_s11 = smov %s953_s21  ;;  %s1093_s12 = smov %s880_s13 }
 0x15a   : > { %s1094_s13 = smov %s1096_s16  ;;  %14 = sbr.rel (!%p12_p9) target bundleno = 4 (0x4), region = 102 }
 0x161   :  { %555 = vsyncpa [#allocation4], 1 }
 0x162   :  { %557 = vsyncpa [#allocation4 + $0x1], 1 }

</bundles_post_ra>
